<compile_context>
chip_gen: v7x
topology: tpu7x:2x2x1
jax: 0.10.0
libtpu: 0.0.40
codegen_flags: <defaults>
</compile_context>

<pallas_src>
import math

import jax
import jax.numpy as jnp
from jax.experimental import pallas as pl
from jax.experimental.pallas import tpu as pltpu

_SQRT_2_INV = 1.0 / math.sqrt(2.0)
_SQRT_2_OVER_PI = math.sqrt(2.0 / math.pi)


def _gelu(x, approximate):
    if approximate:
        # tanh approximation -> EUP slot, overlaps MXU work.
        return 0.5 * x * (1.0 + jnp.tanh(_SQRT_2_OVER_PI * (x + 0.044715 * x * x * x)))
    # Exact GELU (HF ACT2FN["gelu"]): 0.5 * x * (1 + erf(x / sqrt(2)))
    return 0.5 * x * (1.0 + jax.lax.erf(x * _SQRT_2_INV))


def _round_up(x, m):
    return ((x + m - 1) // m) * m


# ----------------------------------------------------------------------------
# Kernels
# ----------------------------------------------------------------------------
def _make_resident_kernel(tk, approximate):
    """Weights fully resident in VMEM; chunk the shared N/K axis in-kernel."""

    def kernel(x_ref, w1_ref, b1_ref, w2_ref, b2_ref, o_ref):
        x = x_ref[...]
        out_dim = w2_ref.shape[1]
        n_chunks = out_dim // tk
        acc = None
        # Chunk j+1's GELU/bias (VPU/EUP) overlaps chunk j's fc2 matmul (MXU);
        # the live f32 intermediate is only (tm, tk).
        for j in range(n_chunks):
            lo = j * tk
            hi = lo + tk
            h = jnp.dot(x, w1_ref[:, lo:hi], preferred_element_type=jnp.float32)
            h = _gelu(h + b1_ref[:, lo:hi].astype(jnp.float32), approximate)
            part = jnp.dot(h.astype(w2_ref.dtype), w2_ref[lo:hi, :],
                           preferred_element_type=jnp.float32)
            acc = part if acc is None else acc + part
        acc = acc + b2_ref[...].astype(jnp.float32)
        o_ref[...] = acc.astype(o_ref.dtype)

    return kernel


def _make_streamed_kernel(approximate):
    """Weights streamed in (in_dim, tk)/(tk, out_dim) slices along a grid axis."""

    def kernel(x_ref, w1_ref, b1_ref, w2_ref, b2_ref, o_ref, acc_ref):
        k = pl.program_id(1)

        @pl.when(k == 0)
        def _():
            acc_ref[...] = jnp.zeros_like(acc_ref)

        h = jnp.dot(x_ref[...], w1_ref[...], preferred_element_type=jnp.float32)
        h = _gelu(h + b1_ref[...].astype(jnp.float32), approximate)
        acc_ref[...] += jnp.dot(h.astype(w2_ref.dtype), w2_ref[...],
                                preferred_element_type=jnp.float32)

        @pl.when(k == pl.num_programs(1) - 1)
        def _():
            o_ref[...] = (acc_ref[...]
                          + b2_ref[...].astype(jnp.float32)).astype(o_ref.dtype)

    return kernel


# ----------------------------------------------------------------------------
# Planning helpers (VMEM budget, tile selection)
# ----------------------------------------------------------------------------
def _vmem_budget_bytes():
    capacity = 64 * 1024 * 1024  # conservative default (v7x per-TC VMEM)
    try:
        info = pltpu.get_tpu_info()
        cap = getattr(info, "vmem_capacity_bytes", None)
        if cap:
            capacity = int(cap)
    except Exception:
        pass
    # Leave headroom for Mosaic internal scratch / semaphores.
    return max(32 * 1024 * 1024, capacity - 16 * 1024 * 1024)


def _resident_vmem_bytes(tm, in_dim, out_dim, tk, itemsize):
    return (
        2 * tm * in_dim * itemsize                               # x tile (x2 buf)
        + 2 * tm * out_dim * itemsize                            # out tile (x2 buf)
        + 2 * (in_dim * out_dim + out_dim * out_dim) * itemsize  # W1 + W2 buffers
        + 2 * 2 * 8 * out_dim * itemsize                         # biases (sublane pad)
        + tm * out_dim * 4                                       # f32 accumulator
        + tm * tk * 4 + tm * tk * itemsize                       # h f32 + cast copy
    )


def _streamed_vmem_bytes(tm, in_dim, out_dim, tk, itemsize):
    return (
        2 * tm * in_dim * itemsize
        + 2 * tm * out_dim * itemsize
        + 2 * (in_dim * tk + tk * out_dim) * itemsize            # W1/W2 chunks (x2 buf)
        + 2 * 8 * (tk + out_dim) * itemsize                      # bias chunks
        + tm * out_dim * 4                                       # f32 accumulator scratch
        + tm * tk * 4 + tm * tk * itemsize
    )


def _pick_inner_chunk(out_dim):
    for tk in (512, 256, 128):
        if out_dim % tk == 0:
            return tk
    return out_dim


def _plan(M, in_dim, out_dim, itemsize, budget, user_tm):
    if user_tm is not None:
        base_tm = max(128, _round_up(int(user_tm), 128))
    else:
        base_tm = 512 if budget >= 96 * 1024 * 1024 else 256
    # Don't allocate row tiles much larger than the problem.
    base_tm = min(base_tm, max(128, _round_up(M, 128)))
    # v7x megacore: prefer >= 2 row tiles so both TensorCores get work.
    if M > 128 and pl.cdiv(M, base_tm) == 1:
        base_tm = max(128, _round_up(pl.cdiv(M, 2), 128))

    tk_inner = _pick_inner_chunk(out_dim)

    for tm in range(base_tm, 127, -128):
        if _resident_vmem_bytes(tm, in_dim, out_dim, tk_inner, itemsize) <= budget:
            return ("resident", tm, tk_inner)
        for tk in (512, 256, 128):
            if out_dim % tk == 0 and \
                    _streamed_vmem_bytes(tm, in_dim, out_dim, tk, itemsize) <= budget:
                return ("streamed", tm, tk)

    # Nothing fits the budget: best effort at the smallest MXU-aligned tile.
    for tk in (128, 256, 512):
        if out_dim % tk == 0:
            return ("streamed", 128, tk)
    return ("resident", 128, tk_inner)


def _cost_estimate(M, in_dim, out_dim, itemsize):
    flops = 2 * M * in_dim * out_dim + 2 * M * out_dim * out_dim
    bytes_accessed = (
        M * in_dim * itemsize
        + (in_dim * out_dim + out_dim * out_dim + 2 * out_dim) * itemsize
        + M * out_dim * itemsize
    )
    return pl.CostEstimate(flops=flops, transcendentals=M * out_dim,
                           bytes_accessed=bytes_accessed)


# ----------------------------------------------------------------------------
# pallas_call builders
# ----------------------------------------------------------------------------
def _build_resident(M, in_dim, out_dim, tm, tk, dtype, vmem_limit, approximate):
    itemsize = jnp.dtype(dtype).itemsize
    return pl.pallas_call(
        _make_resident_kernel(tk, approximate),
        out_shape=jax.ShapeDtypeStruct((M, out_dim), dtype),
        grid_spec=pltpu.PrefetchScalarGridSpec(
            num_scalar_prefetch=0,
            grid=(pl.cdiv(M, tm),),
            in_specs=[
                pl.BlockSpec((tm, in_dim), lambda i: (i, 0)),       # x row tile
                pl.BlockSpec((in_dim, out_dim), lambda i: (0, 0)),  # W1 (resident)
                pl.BlockSpec((1, out_dim), lambda i: (0, 0)),       # b1
                pl.BlockSpec((out_dim, out_dim), lambda i: (0, 0)),  # W2 (resident)
                pl.BlockSpec((1, out_dim), lambda i: (0, 0)),       # b2
            ],
            out_specs=pl.BlockSpec((tm, out_dim), lambda i: (i, 0)),
        ),
        compiler_params=pltpu.CompilerParams(
            dimension_semantics=("parallel",),
            vmem_limit_bytes=vmem_limit,
        ),
        cost_estimate=_cost_estimate(M, in_dim, out_dim, itemsize),
    )


def _build_streamed(M, in_dim, out_dim, tm, tk, dtype, vmem_limit, approximate):
    itemsize = jnp.dtype(dtype).itemsize
    return pl.pallas_call(
        _make_streamed_kernel(approximate),
        out_shape=jax.ShapeDtypeStruct((M, out_dim), dtype),
        grid_spec=pltpu.PrefetchScalarGridSpec(
            num_scalar_prefetch=0,
            grid=(pl.cdiv(M, tm), out_dim // tk),
            in_specs=[
                pl.BlockSpec((tm, in_dim), lambda i, k: (i, 0)),    # x (resident over k)
                pl.BlockSpec((in_dim, tk), lambda i, k: (0, k)),    # W1 column slice
                pl.BlockSpec((1, tk), lambda i, k: (0, k)),         # b1 slice
                pl.BlockSpec((tk, out_dim), lambda i, k: (k, 0)),   # W2 row slice
                pl.BlockSpec((1, out_dim), lambda i, k: (0, 0)),    # b2
            ],
            out_specs=pl.BlockSpec((tm, out_dim), lambda i, k: (i, 0)),
            scratch_shapes=[pltpu.VMEM((tm, out_dim), jnp.float32)],
        ),
        compiler_params=pltpu.CompilerParams(
            dimension_semantics=("parallel", "arbitrary"),
            vmem_limit_bytes=vmem_limit,
        ),
        cost_estimate=_cost_estimate(M, in_dim, out_dim, itemsize),
    )


# ----------------------------------------------------------------------------
# Public wrapper
# ----------------------------------------------------------------------------
def mlp_connector(hidden_states, w1, b1, w2, b2, *, tm=None,
                  approximate_gelu=False, _force_plan=None):
    """MLPconnector forward: fc2(gelu(fc1(x))).

    hidden_states: (..., in_dim)
    w1: (in_dim, out_dim),  b1: (out_dim,)   [fc1 weight stored transposed]
    w2: (out_dim, out_dim), b2: (out_dim,)   [fc2 weight stored transposed]

    `tm` (row tile) is clamped to a multiple of 128 (MXU alignment). Pass bf16
    activations/weights on v6e/v7x for full MXU throughput; accumulation is
    always f32. `approximate_gelu=True` uses the tanh approximation (EUP).
    """
    *lead, in_dim = hidden_states.shape
    out_dim = w1.shape[1]
    M = int(math.prod(lead)) if lead else 1
    dtype = hidden_states.dtype
    itemsize = jnp.dtype(dtype).itemsize

    budget = _vmem_budget_bytes()
    if _force_plan is not None:
        mode, tm_sel, tk = _force_plan
    else:
        mode, tm_sel, tk = _plan(M, in_dim, out_dim, itemsize, budget, tm)

    x = hidden_states.reshape(M, in_dim)         # free reshape; no HBM pad/slice
    b1_2d = b1.reshape(1, out_dim)
    b2_2d = b2.reshape(1, out_dim)

    if mode == "resident":
        call = _build_resident(M, in_dim, out_dim, tm_sel, tk, dtype,
                               budget, approximate_gelu)
    else:
        call = _build_streamed(M, in_dim, out_dim, tm_sel, tk, dtype,
                               budget, approximate_gelu)
    out = call(x, w1, b1_2d, w2, b2_2d)
    return out.reshape(*lead, out_dim)


def _reference(hidden_states, w1, b1, w2, b2):
    h = jnp.dot(hidden_states, w1) + b1
    h = _gelu(h, approximate=False)
    return jnp.dot(h, w2) + b2


if __name__ == "__main__":
    key = jax.random.PRNGKey(0)
    (kx, kw1, kb1, kw2, kb2, kx2,
     kx3, kw3, kb3, kw4, kb4) = jax.random.split(key, 11)

    # --- Test 1: small module-consistent shapes, resident-weight path.
    batch, seq, in_dim, out_dim = 2, 8, 32, 32
    x = jax.random.normal(kx, (batch, seq, in_dim), dtype=jnp.float32)
    lim1 = 1.0 / math.sqrt(in_dim)
    lim2 = 1.0 / math.sqrt(out_dim)
    w1 = jax.random.uniform(kw1, (in_dim, out_dim), jnp.float32, -lim1, lim1)
    b1 = jax.random.uniform(kb1, (out_dim,), jnp.float32, -lim1, lim1)
    w2 = jax.random.uniform(kw2, (out_dim, out_dim), jnp.float32, -lim2, lim2)
    b2 = jax.random.uniform(kb2, (out_dim,), jnp.float32, -lim2, lim2)

    out = jax.block_until_ready(mlp_connector(x, w1, b1, w2, b2))
    ref = _reference(x, w1, b1, w2, b2)
    assert out.shape == (batch, seq, out_dim)
    assert jnp.allclose(out, ref, atol=1e-5, rtol=1e-5), "mismatch vs reference (test 1)"

    # --- Test 2: ragged multi-tile grid (M=200, tm=128 -> 2 tiles, partial tail),
    #             no HBM pad/slice.
    x2 = jax.random.normal(kx2, (4, 50, in_dim), dtype=jnp.float32)
    out2 = jax.block_until_ready(mlp_connector(x2, w1, b1, w2, b2, tm=128))
    ref2 = _reference(x2, w1, b1, w2, b2)
    assert out2.shape == (4, 50, out_dim)
    assert jnp.allclose(out2, ref2, atol=1e-5, rtol=1e-5), "mismatch vs reference (test 2)"

    # --- Test 3: force the streamed-weight path (grid K axis + f32 accumulator
    #             scratch), which large connector dims take on v7x's 64 MiB VMEM.
    in3, out3 = 64, 256
    x3 = jax.random.normal(kx3, (2, 12, in3), dtype=jnp.float32)
    l1 = 1.0 / math.sqrt(in3)
    l2 = 1.0 / math.sqrt(out3)
    w3 = jax.random.uniform(kw3, (in3, out3), jnp.float32, -l1, l1)
    b3 = jax.random.uniform(kb3, (out3,), jnp.float32, -l1, l1)
    w4 = jax.random.uniform(kw4, (out3, out3), jnp.float32, -l2, l2)
    b4 = jax.random.uniform(kb4, (out3,), jnp.float32, -l2, l2)
    out3_ = jax.block_until_ready(
        mlp_connector(x3, w3, b3, w4, b4, _force_plan=("streamed", 128, 128)))
    ref3 = _reference(x3, w3, b3, w4, b4)
    assert out3_.shape == (2, 12, out3)
    assert jnp.allclose(out3_, ref3, atol=5e-4, rtol=5e-4), "mismatch vs reference (test 3)"

    print("KERNEL_OK")
</pallas_src>

<mosaic_0001>
module attributes {stable_mosaic.version = 11 : i64} {
  func.func @kernel(%arg0: i32, %arg1: memref<128x32xf32, #tpu.memory_space<vmem>>, %arg2: memref<32x32xf32, #tpu.memory_space<vmem>>, %arg3: memref<1x32xf32, #tpu.memory_space<vmem>>, %arg4: memref<32x32xf32, #tpu.memory_space<vmem>>, %arg5: memref<1x32xf32, #tpu.memory_space<vmem>>, %arg6: memref<128x32xf32, #tpu.memory_space<vmem>>) attributes {dimension_semantics = [#tpu.dimension_semantics<parallel>], iteration_bounds = array<i64: 1>, scalar_prefetch = 0 : i64, scratch_operands = 0 : i64, tpu.core_type = #tpu.core_type<tc>, window_params = [{transform_indices = @transform_0, window_bounds = array<i64: 128, 32>}, {pipeline_mode = #tpu.pipeline_mode<synchronous>, transform_indices = @transform_1, window_bounds = array<i64: 32, 32>}, {pipeline_mode = #tpu.pipeline_mode<synchronous>, transform_indices = @transform_2, window_bounds = array<i64: 1, 32>}, {pipeline_mode = #tpu.pipeline_mode<synchronous>, transform_indices = @transform_3, window_bounds = array<i64: 32, 32>}, {pipeline_mode = #tpu.pipeline_mode<synchronous>, transform_indices = @transform_4, window_bounds = array<i64: 1, 32>}, {transform_indices = @transform_5, window_bounds = array<i64: 128, 32>}]} {
    %c0 = arith.constant 0 : index
    %c0_0 = arith.constant 0 : index
    %0 = vector.load %arg1[%c0, %c0_0] : memref<128x32xf32, #tpu.memory_space<vmem>>, vector<128x32xf32>
    %c0_1 = arith.constant 0 : index
    %c0_2 = arith.constant 0 : index
    %1 = vector.load %arg2[%c0_1, %c0_2] : memref<32x32xf32, #tpu.memory_space<vmem>>, vector<32x32xf32>
    %cst = arith.constant dense<0.000000e+00> : vector<128x32xf32>
    %2 = tpu.matmul %0, %1, %cst {dimension_numbers = #tpu.dot_dimension_numbers<[1], [0], [0], [1], [0, 0, 1, 1], [], []>} : vector<128x32xf32>, vector<32x32xf32>, vector<128x32xf32> -> vector<128x32xf32>
    %c0_3 = arith.constant 0 : index
    %c0_4 = arith.constant 0 : index
    %3 = vector.load %arg3[%c0_3, %c0_4] : memref<1x32xf32, #tpu.memory_space<vmem>>, vector<1x32xf32>
    %4 = vector.broadcast %3 : vector<1x32xf32> to vector<128x32xf32>
    %5 = arith.addf %2, %4 : vector<128x32xf32>
    %cst_5 = arith.constant 5.000000e-01 : f32
    %6 = vector.broadcast %cst_5 : f32 to vector<128x32xf32>
    %7 = arith.mulf %6, %5 : vector<128x32xf32>
    %cst_6 = arith.constant 0.707106769 : f32
    %8 = vector.broadcast %cst_6 : f32 to vector<128x32xf32>
    %9 = arith.mulf %5, %8 : vector<128x32xf32>
    %10 = math.erf %9 : vector<128x32xf32>
    %cst_7 = arith.constant 1.000000e+00 : f32
    %11 = vector.broadcast %cst_7 : f32 to vector<128x32xf32>
    %12 = arith.addf %11, %10 : vector<128x32xf32>
    %13 = arith.mulf %7, %12 : vector<128x32xf32>
    %c0_8 = arith.constant 0 : index
    %c0_9 = arith.constant 0 : index
    %14 = vector.load %arg4[%c0_8, %c0_9] : memref<32x32xf32, #tpu.memory_space<vmem>>, vector<32x32xf32>
    %cst_10 = arith.constant dense<0.000000e+00> : vector<128x32xf32>
    %15 = tpu.matmul %13, %14, %cst_10 {dimension_numbers = #tpu.dot_dimension_numbers<[1], [0], [0], [1], [0, 0, 1, 1], [], []>} : vector<128x32xf32>, vector<32x32xf32>, vector<128x32xf32> -> vector<128x32xf32>
    %c0_11 = arith.constant 0 : index
    %c0_12 = arith.constant 0 : index
    %16 = vector.load %arg5[%c0_11, %c0_12] : memref<1x32xf32, #tpu.memory_space<vmem>>, vector<1x32xf32>
    %17 = vector.broadcast %16 : vector<1x32xf32> to vector<128x32xf32>
    %18 = arith.addf %15, %17 : vector<128x32xf32>
    %c0_13 = arith.constant 0 : index
    %c0_14 = arith.constant 0 : index
    %19 = vector.load %arg6[%c0_13, %c0_14] : memref<128x32xf32, #tpu.memory_space<vmem>>, vector<128x32xf32>
    tpu.vector_store %arg6[%c0_13, %c0_14], %18 {strides = array<i32>} : memref<128x32xf32, #tpu.memory_space<vmem>>, vector<128x32xf32>,
    return
  }
  func.func @transform_0(%arg0: i32) -> (i32, i32) {
    %c0_i32 = arith.constant 0 : i32
    %c0_i32_0 = arith.constant 0 : i32
    return %arg0, %c0_i32 : i32, i32
  }
  func.func @transform_1(%arg0: i32) -> (i32, i32) {
    %c0_i32 = arith.constant 0 : i32
    %c0_i32_0 = arith.constant 0 : i32
    %c0_i32_1 = arith.constant 0 : i32
    return %c0_i32, %c0_i32_0 : i32, i32
  }
  func.func @transform_2(%arg0: i32) -> (i32, i32) {
    %c0_i32 = arith.constant 0 : i32
    %c0_i32_0 = arith.constant 0 : i32
    %c0_i32_1 = arith.constant 0 : i32
    return %c0_i32, %c0_i32_0 : i32, i32
  }
  func.func @transform_3(%arg0: i32) -> (i32, i32) {
    %c0_i32 = arith.constant 0 : i32
    %c0_i32_0 = arith.constant 0 : i32
    %c0_i32_1 = arith.constant 0 : i32
    return %c0_i32, %c0_i32_0 : i32, i32
  }
  func.func @transform_4(%arg0: i32) -> (i32, i32) {
    %c0_i32 = arith.constant 0 : i32
    %c0_i32_0 = arith.constant 0 : i32
    %c0_i32_1 = arith.constant 0 : i32
    return %c0_i32, %c0_i32_0 : i32, i32
  }
  func.func @transform_5(%arg0: i32) -> (i32, i32) {
    %c0_i32 = arith.constant 0 : i32
    %c0_i32_0 = arith.constant 0 : i32
    return %arg0, %c0_i32 : i32, i32
  }
}

</mosaic_0001>

<bundles_post_ra>
// kernel: tpu_custom_call.1
= control target key start
LH: loop header
LB: loop body
LE: loop exit
PB: predicated region body
PF: predicated region fallthrough
CT: control target
= control target key end

     0   :  { %10 = vsyncpa [#allocation3], 0  ;;  %s1075_s0 = inlined_call_operand.hbm [shape: f32[16,32], index: 0, kind: input, shape index: {}]   ;;  %s1076_s1 = inlined_call_operand.hbm [shape: f32[32,32], index: 1, kind: input, shape index: {}]   ;;  %s1077_s2 = inlined_call_operand.vmem [shape: f32[1,32], index: 2, kind: input, shape index: {}]   ;;  %s1078_s3 = inlined_call_operand.hbm [shape: f32[32,32], index: 3, kind: input, shape index: {}]   ;;  %s1079_s4 = inlined_call_operand.vmem [shape: f32[1,32], index: 4, kind: input, shape index: {}]   ;;  %s1080_s5 = inlined_call_operand.hbm [shape: f32[16,32], index: 5, kind: output, shape index: {}]  }
   0x1   :  { %11 = vsyncpa [#allocation6], 0 }
   0x2   :  { %12 = vsyncpa [#allocation4], 0 }
   0x3   :  { %17 = vsyncadd [#allocation3], 1792  ;;  %s887_s18 = smov [#allocation5]   ;;  %s888_s20 = smov [#allocation2]  }
   0x4   :  { %s30_s19 = sshll.u32 %s887_s18, 4  ;;  %s18_s21 = sshll.u32 %s888_s20, 4  ;;  %s31_s19 = int_to_ptr.vmem [resolvable:$true] %s30_s19  ;;  %s923_s21 = int_to_ptr.vmem [resolvable:$true] %s18_s21 }
   0x5   :  { %s793_s24 = scalar_lea.hbm %s1076_s1, 512 }
   0x6   :  { %p794_p0 = scmp.ne.s32.totalorder %s1076_s1, %s793_s24  ;;  %p797_p1 = scmp.lt.u32.totalorder %s793_s24, %s1076_s1 }
   0x8   :  { %p799_p2 = pnand %p797_p1, %p794_p0 }
   0xa   :  { %802 = shalt.err (!%p799_p2)
}
   0xb   :  { %s803_s29 = scalar_lea.vmem %s31_s19, 512  ;;  %p808_p4 = scmp.lt.s32.totalorder %s31_s19, %s31_s19 }
   0xc   :  { %p804_p3 = scmp.ne.s32.totalorder %s31_s19, %s803_s29  ;;  %p809_p5 = scmp.lt.s32.totalorder %s803_s29, %s803_s29 }
   0xe   :  { %p810_p6 = por %p809_p5, %p808_p4 }
  0x10   :  { %p811_p7 = pnand %p810_p6, %p804_p3 }
  0x12   :  { %814 = shalt.err (!%p811_p7)
}
  0x13   :  { %s889_s30 = smov 128   ;;  %s890_s6 = smov 8  }
  0x14   :  { %36 = dma.hbm_to_vmem [thread:$0]  %s1076_s1, 512, %s31_s19, [#allocation6], %s889_s30, %s889_s30, %s890_s6  }
  0x15   :  { %s815_s11 = scalar_lea.hbm %s1075_s0, 256 }
  0x16   :  { %p816_p8 = scmp.ne.s32.totalorder %s1075_s0, %s815_s11  ;;  %p819_p9 = scmp.lt.u32.totalorder %s815_s11, %s1075_s0 }
  0x18   :  { %p821_p10 = pnand %p819_p9, %p816_p8 }
  0x1a   :  { %824 = shalt.err (!%p821_p10)
}
  0x1b   :  { %s825_s16 = scalar_lea.vmem %s923_s21, 256  ;;  %s829_s1 = scalar_lea.vmem %s923_s21, 2048 }
  0x1c   :  { %p826_p11 = scmp.ne.s32.totalorder %s923_s21, %s825_s16  ;;  %p830_p12 = scmp.lt.s32.totalorder %s923_s21, %s923_s21 }
  0x1d   :  { %p831_p13 = scmp.lt.s32.totalorder %s829_s1, %s825_s16 }
  0x1f   :  { %p832_p0 = por %p831_p13, %p830_p12 }
  0x21   :  { %p833_p1 = pnand %p832_p0, %p826_p11 }
  0x23   :  { %836 = shalt.err (!%p833_p1)
}
  0x24   :  { %24 = dma.hbm_to_vmem [thread:$0]  %s1075_s0, 256, %s923_s21, [#allocation3], %s889_s30, %s889_s30, %s890_s6  }
  0x25   :  { %s891_s19 = smov [#allocation7]   ;;  %s837_s24 = scalar_lea.hbm %s1078_s3, 512 }
  0x26   :  { %s44_s20 = sshll.u32 %s891_s19, 4  ;;  %p838_p2 = scmp.ne.s32.totalorder %s1078_s3, %s837_s24  ;;  %s45_s20 = int_to_ptr.vmem [resolvable:$true] %s44_s20 }
  0x27   :  { %p841_p3 = scmp.lt.u32.totalorder %s837_s24, %s1078_s3 }
  0x29   :  { %p843_p4 = pnand %p841_p3, %p838_p2 }
  0x2b   :  { %846 = shalt.err (!%p843_p4)
}
  0x2c   :  { %s847_s29 = scalar_lea.vmem %s45_s20, 512  ;;  %p852_p6 = scmp.lt.s32.totalorder %s45_s20, %s45_s20 }
  0x2d   :  { %p848_p5 = scmp.ne.s32.totalorder %s45_s20, %s847_s29  ;;  %p853_p7 = scmp.lt.s32.totalorder %s847_s29, %s847_s29 }
  0x2f   :  { %p854_p8 = por %p853_p7, %p852_p6 }
  0x31   :  { %p855_p9 = pnand %p854_p8, %p848_p5 }
  0x33   :  { %858 = shalt.err (!%p855_p9)
}
  0x34   :  { %50 = dma.hbm_to_vmem [thread:$0]  %s1078_s3, 512, %s45_s20, [#allocation6], %s889_s30, %s889_s30, %s890_s6  }
  0x35   :  { %881 = dma.done.wait [#allocation3], 2048  }
  0x36   :  { %882 = vsyncadd [#allocation3], 4294965248 }
  0x37   :  { %883 = dma.done.wait [#allocation6], 1024  }
  0x38   :  { %884 = vsyncadd [#allocation6], 4294966272  ;;  %vm89_vm0 = vcmask 261120   ;;  %v78_v0 = vld [vmem:[#allocation5] sm:$0xff]  ;;  %v79_v1 = vld [vmem:[#allocation5 + $0x8] sm:$0xff] }
  0x39   :  { %v80_v2 = vld [vmem:[#allocation5 + $0x10] sm:$0xff]  ;;  %v739_v3 = vpack.c.bf16 %v79_v1, %v78_v0  ;;  %v81_v4 = vld [vmem:[#allocation5 + $0x18] sm:$0xff]  ;;  %v62_v5 = vld [vmem:[#allocation2] sm:$0xff] }
  0x3a   :  { %v743_v6 = vpack.c.bf16 %v81_v4, %v80_v2  ;;  %683 = vmatprep.mubr.msk.f32.mxu0 %vm89_vm0, %v62_v5  ;;  %v63_v7 = vld [vmem:[#allocation2 + $0x8] sm:$0xff]  ;;  %v64_v8 = vld [vmem:[#allocation2 + $0x10] sm:$0xff]  ;;  %v65_v9 = vld [vmem:[#allocation2 + $0x18] sm:$0xff] }
  0x3b   :  { %740 = vmatprep.subr.bf16.mxu0 %v739_v3  ;;  %v66_v10 = vld [vmem:[#allocation2 + $0x20] sm:$0xff]  ;;  %v67_v11 = vld [vmem:[#allocation2 + $0x28] sm:$0xff]  ;;  %v68_v12 = vld [vmem:[#allocation2 + $0x30] sm:$0xff] }
  0x3c   :  { %742 = vmatpush3.bf16.msra.mxu0 %v739_v3  ;;  %v69_v13 = vld [vmem:[#allocation2 + $0x38] sm:$0xff]  ;;  %v70_v14 = vld [vmem:[#allocation2 + $0x40] sm:$0xff]  ;;  %v71_v15 = vld [vmem:[#allocation2 + $0x48] sm:$0xff] }
  0x3d   :  { %744 = vmatprep.subr.bf16.mxu0 %v743_v6  ;;  %v72_v16 = vld [vmem:[#allocation2 + $0x50] sm:$0xff]  ;;  %v73_v17 = vld [vmem:[#allocation2 + $0x58] sm:$0xff]  ;;  %v74_v18 = vld [vmem:[#allocation2 + $0x60] sm:$0xff] }
  0x3e   :  { %v75_v19 = vld [vmem:[#allocation2 + $0x68] sm:$0xff]  ;;  %v76_v20 = vld [vmem:[#allocation2 + $0x70] sm:$0xff]  ;;  %v77_v21 = vld [vmem:[#allocation2 + $0x78] sm:$0xff] }
  0x3f   :  { %v363_v22 = vld [vmem:[#allocation7] sm:$0xff]  ;;  %v364_v23 = vld [vmem:[#allocation7 + $0x8] sm:$0xff]  ;;  %v365_v25 = vld [vmem:[#allocation7 + $0x10] sm:$0xff] }
  0x40   :  { %746 = vmatpush3.bf16.msra.mxu0 %v743_v6  ;;  %v747_v24 = vpack.c.bf16 %v364_v23, %v363_v22  ;;  %v366_v26 = vld [vmem:[#allocation7 + $0x18] sm:$0xff]  ;;  %v995_v28 = vld [vmem:[%s1077_s2] ss:$0 sm:$0xff] }
  0x41   :  { %v751_v27 = vpack.c.bf16 %v366_v26, %v365_v25 }
  0x42   :  { %748 = vmatprep.subr.bf16.mxu1 %v747_v24 }
  0x43   :  { %684 = vmatmul.mubr.msk.f32.vlgmr.msra.gmra.mrb[0].mxu0 %vm89_vm0, %v63_v7  ;;  %750 = vmatpush3.bf16.msra.mxu1 %v747_v24 }
  0x44   :  { %686 = vmatprep.mubr.msk.f32.mxu0 %vm89_vm0, %v64_v8  ;;  %752 = vmatprep.subr.bf16.mxu1 %v751_v27 }
  0x47   :  { %687 = vmatmul.mubr.msk.f32.gmra.mrb[2].mxu0 %vm89_vm0, %v65_v9  ;;  %754 = vmatpush3.bf16.msra.mxu1 %v751_v27 }
  0x48   :  { %689 = vmatprep.mubr.msk.f32.mxu0 %vm89_vm0, %v66_v10 }
  0x4b   :  { %690 = vmatmul.mubr.msk.f32.gmra.mrb[4].mxu0 %vm89_vm0, %v67_v11 }
  0x4c   :  { %692 = vmatprep.mubr.msk.f32.mxu0 %vm89_vm0, %v68_v12 }
  0x4f   :  { %693 = vmatmul.mubr.msk.f32.gmra.mrb[6].mxu0 %vm89_vm0, %v69_v13 }
  0x50   :  { %695 = vmatprep.mubr.msk.f32.mxu0 %vm89_vm0, %v70_v14 }
  0x53   :  { %696 = vmatmul.mubr.msk.f32.gmra.mrb[8].mxu0 %vm89_vm0, %v71_v15 }
  0x54   :  { %698 = vmatprep.mubr.msk.f32.mxu0 %vm89_vm0, %v72_v16 }
  0x57   :  { %699 = vmatmul.mubr.msk.f32.gmra.mrb[10].mxu0 %vm89_vm0, %v73_v17 }
  0x58   :  { %701 = vmatprep.mubr.msk.f32.mxu0 %vm89_vm0, %v74_v18 }
  0x5b   :  { %702 = vmatmul.mubr.msk.f32.gmra.mrb[12].mxu0 %vm89_vm0, %v75_v19 }
  0x5c   :  { %704 = vmatprep.mubr.msk.f32.mxu0 %vm89_vm0, %v76_v20 }
  0x5f   :  { %705 = vmatmul.mubr.msk.f32.gmra.mrb[14].mxu0 %vm89_vm0, %v77_v21 }
 0x116   :  { %v685_v29 = vpop.f32.mrb[0].mxu0 }
 0x117   :  { %v210_v30 = vadd.f32 %v685_v29, %v995_v28  ;;  %v204_v31 = vpop.f32.mrb[1].mxu0 }
 0x118   :  { %v205_v32 = vadd.f32 %v995_v28, %v204_v31 }
 0x119   :  { %v300_v33 = vmul.f32 0.70710677, %v210_v30  ;;  %v284_v61 = vmul.f32 0.5, %v210_v30 }
 0x11a   :  { %v299_v34 = vmul.f32 0.70710677, %v205_v32  ;;  %v688_v35 = vpop.f32.mrb[2].mxu0  ;;  %v283_v57 = vmul.f32 0.5, %v205_v32 }
 0x11b   :  { %761 = verf.f32 %v300_v33  ;;  %v220_v36 = vadd.f32 %v688_v35, %v995_v28  ;;  %v214_v37 = vpop.f32.mrb[3].mxu0 }
 0x11c   :  { %763 = verf.f32 %v299_v34  ;;  %v215_v38 = vadd.f32 %v995_v28, %v214_v37 }
 0x11d   :  { %v302_v39 = vmul.f32 0.70710677, %v220_v36  ;;  %v286_v11 = vmul.f32 0.5, %v220_v36 }
 0x11e   :  { %v301_v40 = vmul.f32 0.70710677, %v215_v38  ;;  %v691_v41 = vpop.f32.mrb[4].mxu0  ;;  %v285_v7 = vmul.f32 0.5, %v215_v38 }
 0x11f   :  { %765 = verf.f32 %v302_v39  ;;  %v230_v42 = vadd.f32 %v691_v41, %v995_v28  ;;  %v224_v43 = vpop.f32.mrb[5].mxu0 }
 0x120   :  { %767 = verf.f32 %v301_v40  ;;  %v225_v44 = vadd.f32 %v995_v28, %v224_v43 }
 0x121   :  { %v304_v45 = vmul.f32 0.70710677, %v230_v42  ;;  %v288_v25 = vmul.f32 0.5, %v230_v42 }
 0x122   :  { %v303_v46 = vmul.f32 0.70710677, %v225_v44  ;;  %v694_v47 = vpop.f32.mrb[6].mxu0  ;;  %v287_v21 = vmul.f32 0.5, %v225_v44 }
 0x123   :  { %769 = verf.f32 %v304_v45  ;;  %v1004_v48 = vadd.f32 %v694_v47, %v995_v28  ;;  %v234_v49 = vpop.f32.mrb[7].mxu0 }
 0x124   :  { %771 = verf.f32 %v303_v46  ;;  %v235_v50 = vadd.f32 %v995_v28, %v234_v49 }
 0x125   :  { %v762_v51 = vpop.eup %761  ;;  %v306_v52 = vmul.f32 0.70710677, %v1004_v48  ;;  %v290_v40 = vmul.f32 0.5, %v1004_v48 }
 0x126   :  { %v764_v53 = vpop.eup %763  ;;  %v332_v54 = vadd.f32 1.0, %v762_v51  ;;  %v305_v55 = vmul.f32 0.70710677, %v235_v50  ;;  %v697_v56 = vpop.f32.mrb[8].mxu0  ;;  %v289_v36 = vmul.f32 0.5, %v235_v50 }
 0x127   :  { %773 = verf.f32 %v306_v52  ;;  %v1009_v58 = vadd.f32 %v697_v56, %v995_v28  ;;  %v244_v59 = vpop.f32.mrb[9].mxu0  ;;  %v331_v60 = vadd.f32 1.0, %v764_v53 }
 0x128   :  { %775 = verf.f32 %v305_v55  ;;  %v245_v62 = vadd.f32 %v995_v28, %v244_v59  ;;  %v348_v3 = vmul.f32 %v332_v54, %v284_v61 }
 0x129   :  { %v766_v63 = vpop.eup %765  ;;  %v308_v0 = vmul.f32 0.70710677, %v1009_v58  ;;  %v347_v1 = vmul.f32 %v331_v60, %v283_v57  ;;  %v292_v52 = vmul.f32 0.5, %v1009_v58 }
 0x12a   :  { %v768_v2 = vpop.eup %767  ;;  %v334_v4 = vadd.f32 1.0, %v766_v63  ;;  %v307_v5 = vmul.f32 0.70710677, %v245_v62  ;;  %v700_v6 = vpop.f32.mrb[10].mxu0  ;;  %v291_v50 = vmul.f32 0.5, %v245_v62 }
 0x12b   :  { %v333_v8 = vadd.f32 1.0, %v768_v2  ;;  %777 = verf.f32 %v308_v0  ;;  %v1014_v9 = vadd.f32 %v700_v6, %v995_v28  ;;  %v254_v10 = vpop.f32.mrb[11].mxu0  ;;  %715 = vmatprep.mubr.msk.f32.mxu1 %vm89_vm0, %v347_v1 }
 0x12c   :  { %779 = verf.f32 %v307_v5  ;;  %v255_v12 = vadd.f32 %v995_v28, %v254_v10  ;;  %716 = vmatmul.mubr.msk.f32.vlgmr.msra.gmra.mrb[0].mxu1 %vm89_vm0, %v348_v3  ;;  %v350_v17 = vmul.f32 %v334_v4, %v286_v11 }
 0x12d   :  { %v770_v13 = vpop.eup %769  ;;  %v349_v14 = vmul.f32 %v333_v8, %v285_v7  ;;  %v310_v15 = vmul.f32 0.70710677, %v1014_v9  ;;  %v294_v59 = vmul.f32 0.5, %v1014_v9 }
 0x12e   :  { %v772_v16 = vpop.eup %771  ;;  %v336_v18 = vadd.f32 1.0, %v770_v13  ;;  %v309_v19 = vmul.f32 0.70710677, %v255_v12  ;;  %v703_v20 = vpop.f32.mrb[12].mxu0  ;;  %v293_v56 = vmul.f32 0.5, %v255_v12 }
 0x12f   :  { %v335_v22 = vadd.f32 1.0, %v772_v16  ;;  %781 = verf.f32 %v310_v15  ;;  %v270_v23 = vadd.f32 %v703_v20, %v995_v28  ;;  %v264_v24 = vpop.f32.mrb[13].mxu0  ;;  %718 = vmatprep.mubr.msk.f32.mxu1 %vm89_vm0, %v349_v14  ;;  %v618_v13 = vld [vmem:[%s1079_s4] ss:$0 sm:$0xff] }
 0x130   :  { %783 = verf.f32 %v309_v19  ;;  %v265_v26 = vadd.f32 %v995_v28, %v264_v24  ;;  %719 = vmatmul.mubr.msk.f32.gmra.mrb[2].mxu1 %vm89_vm0, %v350_v17  ;;  %v352_v32 = vmul.f32 %v336_v18, %v288_v25 }
 0x131   :  { %v774_v27 = vpop.eup %773  ;;  %v351_v29 = vmul.f32 %v335_v22, %v287_v21  ;;  %v312_v30 = vmul.f32 0.70710677, %v270_v23  ;;  %v296_v2 = vmul.f32 0.5, %v270_v23 }
 0x132   :  { %v776_v31 = vpop.eup %775  ;;  %v338_v33 = vadd.f32 1.0, %v774_v27  ;;  %v311_v34 = vmul.f32 0.70710677, %v265_v26  ;;  %v706_v35 = vpop.f32.mrb[14].mxu0  ;;  %v295_v0 = vmul.f32 0.5, %v265_v26 }
 0x133   :  { %v337_v37 = vadd.f32 1.0, %v776_v31  ;;  %785 = verf.f32 %v312_v30  ;;  %v280_v38 = vadd.f32 %v706_v35, %v995_v28  ;;  %v274_v39 = vpop.f32.mrb[15].mxu0  ;;  %721 = vmatprep.mubr.msk.f32.mxu1 %vm89_vm0, %v351_v29 }
 0x134   :  { %787 = verf.f32 %v311_v34  ;;  %v275_v41 = vadd.f32 %v995_v28, %v274_v39  ;;  %722 = vmatmul.mubr.msk.f32.gmra.mrb[4].mxu1 %vm89_vm0, %v352_v32  ;;  %v354_v46 = vmul.f32 %v338_v33, %v290_v40 }
 0x135   :  { %v778_v42 = vpop.eup %777  ;;  %v353_v43 = vmul.f32 %v337_v37, %v289_v36  ;;  %v314_v44 = vmul.f32 0.70710677, %v280_v38  ;;  %v298_v10 = vmul.f32 0.5, %v280_v38 }
 0x136   :  { %v780_v45 = vpop.eup %779  ;;  %v340_v47 = vadd.f32 1.0, %v778_v42  ;;  %v313_v49 = vmul.f32 0.70710677, %v275_v41  ;;  %v297_v8 = vmul.f32 0.5, %v275_v41 }
 0x137   :  { %v339_v51 = vadd.f32 1.0, %v780_v45  ;;  %789 = verf.f32 %v314_v44  ;;  %724 = vmatprep.mubr.msk.f32.mxu1 %vm89_vm0, %v353_v43 }
 0x138   :  { %791 = verf.f32 %v313_v49  ;;  %725 = vmatmul.mubr.msk.f32.gmra.mrb[6].mxu1 %vm89_vm0, %v354_v46  ;;  %v356_v54 = vmul.f32 %v340_v47, %v292_v52 }
 0x139   :  { %v782_v28 = vpop.eup %781  ;;  %v355_v48 = vmul.f32 %v339_v51, %v291_v50 }
 0x13a   :  { %v784_v53 = vpop.eup %783  ;;  %v342_v55 = vadd.f32 1.0, %v782_v28 }
 0x13b   :  { %v341_v57 = vadd.f32 1.0, %v784_v53  ;;  %727 = vmatprep.mubr.msk.f32.mxu1 %vm89_vm0, %v355_v48 }
 0x13c   :  { %728 = vmatmul.mubr.msk.f32.gmra.mrb[8].mxu1 %vm89_vm0, %v356_v54  ;;  %v358_v58 = vmul.f32 %v342_v55, %v294_v59 }
 0x13d   :  { %v786_v60 = vpop.eup %785  ;;  %v357_v61 = vmul.f32 %v341_v57, %v293_v56 }
 0x13e   :  { %v788_v62 = vpop.eup %787  ;;  %v344_v63 = vadd.f32 1.0, %v786_v60 }
 0x13f   :  { %v343_v1 = vadd.f32 1.0, %v788_v62  ;;  %730 = vmatprep.mubr.msk.f32.mxu1 %vm89_vm0, %v357_v61 }
 0x140   :  { %731 = vmatmul.mubr.msk.f32.gmra.mrb[10].mxu1 %vm89_vm0, %v358_v58  ;;  %v360_v6 = vmul.f32 %v344_v63, %v296_v2 }
 0x141   :  { %v790_v3 = vpop.eup %789  ;;  %v359_v4 = vmul.f32 %v343_v1, %v295_v0 }
 0x142   :  { %v792_v5 = vpop.eup %791  ;;  %v346_v7 = vadd.f32 1.0, %v790_v3 }
 0x143   :  { %v345_v9 = vadd.f32 1.0, %v792_v5  ;;  %733 = vmatprep.mubr.msk.f32.mxu1 %vm89_vm0, %v359_v4 }
 0x144   :  { %734 = vmatmul.mubr.msk.f32.gmra.mrb[12].mxu1 %vm89_vm0, %v360_v6  ;;  %v362_v12 = vmul.f32 %v346_v7, %v298_v10 }
 0x145   :  { %v361_v11 = vmul.f32 %v345_v9, %v297_v8 }
 0x147   :  { %736 = vmatprep.mubr.msk.f32.mxu1 %vm89_vm0, %v361_v11 }
 0x148   :  { %737 = vmatmul.mubr.msk.f32.gmra.mrb[14].mxu1 %vm89_vm0, %v362_v12 }
 0x1ff   :  { %v717_v14 = vpop.f32.mrb[0].mxu1 }
 0x200   :  { %v494_v15 = vadd.f32 %v717_v14, %v618_v13  ;;  %v488_v16 = vpop.f32.mrb[1].mxu1 }
 0x201   :  { %v489_v17 = vadd.f32 %v618_v13, %v488_v16 }
 0x202   :  { %568 = vst.msk [vmem:[#allocation8 + $0x8] sm:$0xff] %vm89_vm0, %v494_v15 }
 0x203   :  { %567 = vst.msk [vmem:[#allocation8] sm:$0xff] %vm89_vm0, %v489_v17  ;;  %v720_v18 = vpop.f32.mrb[2].mxu1 }
 0x204   :  { %v504_v19 = vadd.f32 %v720_v18, %v618_v13  ;;  %v498_v20 = vpop.f32.mrb[3].mxu1 }
 0x205   :  { %v499_v21 = vadd.f32 %v618_v13, %v498_v20 }
 0x206   :  { %570 = vst.msk [vmem:[#allocation8 + $0x18] sm:$0xff] %vm89_vm0, %v504_v19 }
 0x207   :  { %569 = vst.msk [vmem:[#allocation8 + $0x10] sm:$0xff] %vm89_vm0, %v499_v21  ;;  %v723_v22 = vpop.f32.mrb[4].mxu1 }
 0x208   :  { %v514_v23 = vadd.f32 %v723_v22, %v618_v13  ;;  %v508_v24 = vpop.f32.mrb[5].mxu1 }
 0x209   :  { %v509_v25 = vadd.f32 %v618_v13, %v508_v24 }
 0x20a   :  { %572 = vst.msk [vmem:[#allocation8 + $0x28] sm:$0xff] %vm89_vm0, %v514_v23 }
 0x20b   :  { %571 = vst.msk [vmem:[#allocation8 + $0x20] sm:$0xff] %vm89_vm0, %v509_v25  ;;  %v726_v26 = vpop.f32.mrb[6].mxu1 }
 0x20c   :  { %v524_v27 = vadd.f32 %v726_v26, %v618_v13  ;;  %v518_v29 = vpop.f32.mrb[7].mxu1 }
 0x20d   :  { %v519_v30 = vadd.f32 %v618_v13, %v518_v29 }
 0x20e   :  { %574 = vst.msk [vmem:[#allocation8 + $0x38] sm:$0xff] %vm89_vm0, %v524_v27 }
 0x20f   :  { %573 = vst.msk [vmem:[#allocation8 + $0x30] sm:$0xff] %vm89_vm0, %v519_v30  ;;  %v729_v31 = vpop.f32.mrb[8].mxu1 }
 0x210   :  { %v534_v32 = vadd.f32 %v729_v31, %v618_v13  ;;  %v528_v33 = vpop.f32.mrb[9].mxu1 }
 0x211   :  { %v529_v34 = vadd.f32 %v618_v13, %v528_v33 }
 0x212   :  { %576 = vst.msk [vmem:[#allocation8 + $0x48] sm:$0xff] %vm89_vm0, %v534_v32 }
 0x213   :  { %575 = vst.msk [vmem:[#allocation8 + $0x40] sm:$0xff] %vm89_vm0, %v529_v34  ;;  %v732_v35 = vpop.f32.mrb[10].mxu1 }
 0x214   :  { %v544_v36 = vadd.f32 %v732_v35, %v618_v13  ;;  %v538_v37 = vpop.f32.mrb[11].mxu1 }
 0x215   :  { %v539_v38 = vadd.f32 %v618_v13, %v538_v37 }
 0x216   :  { %578 = vst.msk [vmem:[#allocation8 + $0x58] sm:$0xff] %vm89_vm0, %v544_v36 }
 0x217   :  { %577 = vst.msk [vmem:[#allocation8 + $0x50] sm:$0xff] %vm89_vm0, %v539_v38  ;;  %v735_v39 = vpop.f32.mrb[12].mxu1 }
 0x218   :  { %v554_v40 = vadd.f32 %v735_v39, %v618_v13  ;;  %v548_v41 = vpop.f32.mrb[13].mxu1 }
 0x219   :  { %v549_v42 = vadd.f32 %v618_v13, %v548_v41 }
 0x21a   :  { %580 = vst.msk [vmem:[#allocation8 + $0x68] sm:$0xff] %vm89_vm0, %v554_v40 }
 0x21b   :  { %579 = vst.msk [vmem:[#allocation8 + $0x60] sm:$0xff] %vm89_vm0, %v549_v42  ;;  %v738_v43 = vpop.f32.mrb[14].mxu1 }
 0x21c   :  { %v564_v44 = vadd.f32 %v738_v43, %v618_v13  ;;  %v558_v45 = vpop.f32.mrb[15].mxu1 }
 0x21d   :  { %v559_v46 = vadd.f32 %v618_v13, %v558_v45 }
 0x21e   :  { %582 = vst.msk [vmem:[#allocation8 + $0x78] sm:$0xff] %vm89_vm0, %v564_v44 }
 0x21f   :  { %581 = vst.msk [vmem:[#allocation8 + $0x70] sm:$0xff] %vm89_vm0, %v559_v46 }
 0x220   :  { %587 = vsyncadd [#allocation4], 1792  ;;  %s892_s4 = smov [#allocation8]  }
 0x221   :  { %s588_s9 = sshll.u32 %s892_s4, 4  ;;  %s589_s9 = int_to_ptr.vmem [resolvable:$true] %s588_s9 }
 0x222   :  { %s859_s10 = scalar_lea.vmem %s589_s9, 256  ;;  %s863_s11 = scalar_lea.vmem %s589_s9, 2048 }
 0x223   :  { %p860_p10 = scmp.ne.s32.totalorder %s589_s9, %s859_s10  ;;  %p864_p11 = scmp.lt.s32.totalorder %s589_s9, %s589_s9 }
 0x224   :  { %p865_p12 = scmp.lt.s32.totalorder %s863_s11, %s859_s10 }
 0x226   :  { %p866_p13 = por %p865_p12, %p864_p11 }
 0x228   :  { %p867_p0 = pnand %p866_p13, %p860_p10 }
 0x22a   :  { %870 = shalt.err (!%p867_p0)
}
 0x22b   :  { %s871_s14 = scalar_lea.hbm %s1080_s5, 256 }
 0x22c   :  { %p872_p1 = scmp.ne.s32.totalorder %s1080_s5, %s871_s14  ;;  %p875_p2 = scmp.lt.u32.totalorder %s871_s14, %s1080_s5 }
 0x22e   :  { %p877_p3 = pnand %p875_p2, %p872_p1 }
 0x230   :  { %880 = shalt.err (!%p877_p3)
}
 0x231   :  { %594 = dma.vmem_to_hbm [thread:$0]  %s589_s9, 256, %s1080_s5, [#allocation4], %s889_s30, %s889_s30, %s890_s6  }
 0x232   :  { %885 = dma.done.wait [#allocation4], 2048  }
 0x233   :  { %886 = vsyncadd [#allocation4], 4294965248 }
 0x234   :  { %598 = vsyncpa [#allocation3], 1 }
 0x235   :  { %599 = vsyncpa [#allocation6], 1 }
 0x236   :  { %600 = vsyncpa [#allocation4], 1 }

</bundles_post_ra>
